<compile_context>
chip_gen: v7x
topology: tpu7x:2x2x1
jax: 0.10.0
libtpu: 0.0.40
codegen_flags: <defaults>
</compile_context>

<pallas_src>
import jax
import jax.numpy as jnp
import numpy as np
from jax.experimental import pallas as pl
from jax.experimental.pallas import tpu as pltpu


def _round_up(x, m):
    return (x + m - 1) // m * m


# ----------------------------- Pallas kernel ------------------------------

def make_net_kernel(layer_meta, mlr_meta, pool_size):
    """layer_meta: tuple of (row_off, in_dim, out_dim, do_maxout, group_size)
       mlr_meta:   (row_off, in_dim, out_dim_padded)
       All metadata are Python ints baked at trace time (static slices)."""

    def kernel(x_ref, p_ref, o_ref):
        act = x_ref[...]                                   # [TILE_B, IN_W]
        for (off, in_d, out_d, do_max, g) in layer_meta:
            w = p_ref[off:off + in_d, 0:out_d]             # static slice of packed params
            b = p_ref[off + in_d:off + in_d + 1, 0:out_d]  # bias row
            act = jnp.dot(act, w, preferred_element_type=jnp.float32) + b
            if do_max:
                # pool member p of group j lives at column p*g + j (pre-permuted)
                m = act[:, 0:g]
                for p in range(1, pool_size):
                    m = jnp.maximum(m, act[:, p * g:(p + 1) * g])
                act = m                                    # [TILE_B, g] = [h_max | hz_max]

        off, in_d, out_d = mlr_meta
        w = p_ref[off:off + in_d, 0:out_d]
        b = p_ref[off + in_d:off + in_d + 1, 0:out_d]
        # act = [h | hz]  ->  feat = [h^2 | hz^2 | h | hz]  (MLR rows pre-permuted to match)
        feat = jnp.concatenate([act * act, act], axis=1)
        y = jnp.dot(feat, w, preferred_element_type=jnp.float32) + b   # [TILE_B, y_pad]
        # single lane-dense full-width store: [y_pad | h | hz]
        o_ref[...] = jnp.concatenate([y, act], axis=1)

    return kernel


# ----------------------------- parameter packing ---------------------------

def pack_params(layer, layerz, mlr, pool_size, in_w):
    """Fuse h/z branches into block-diagonal layers, pre-permute maxout columns,
    permute MLR rows for the [h^2|hz^2|h|hz] feature order, zero-pad the MLR output
    to a 128-lane-aligned slab, and pack everything into ONE f32 buffer."""
    nL = len(layer)
    # TODO(synk): unequal branch depths (custom h_sizes_z length) would need a
    # non-fused tail; the module's default (h_sizes_z = h_sizes) always matches.
    assert len(layerz) == nL, "block-diagonal fusion requires equal branch depths"

    fused, meta_raw = [], []
    for k in range(nL):
        Wh = np.asarray(layer[k][0], np.float32).T      # [in_h, out_h]
        bh = np.asarray(layer[k][1], np.float32)
        Wz = np.asarray(layerz[k][0], np.float32).T     # [in_z, out_z]
        bz = np.asarray(layerz[k][1], np.float32)
        in_h, out_h = Wh.shape
        in_z, out_z = Wz.shape
        last = (k == nL - 1)

        if not last:
            gh, gz = out_h // pool_size, out_z // pool_size
            g = gh + gz
            Wf = np.zeros((in_h + in_z, pool_size * g), np.float32)
            bf = np.zeros((pool_size * g,), np.float32)
            for p in range(pool_size):
                hcols = np.arange(gh) * pool_size + p   # torch maxout member p of group g
                zcols = np.arange(gz) * pool_size + p
                Wf[:in_h, p * g:p * g + gh] = Wh[:, hcols]
                Wf[in_h:, p * g + gh:(p + 1) * g] = Wz[:, zcols]
                bf[p * g:p * g + gh] = bh[hcols]
                bf[p * g + gh:(p + 1) * g] = bz[zcols]
            do_max, gsz = True, g
        else:
            Wf = np.zeros((in_h + in_z, out_h + out_z), np.float32)
            Wf[:in_h, :out_h] = Wh
            Wf[in_h:, out_h:] = Wz
            bf = np.concatenate([bh, bz])
            do_max, gsz = False, 0

        if k == 0 and Wf.shape[0] < in_w:
            # input activations are zero-padded to in_w lanes -> pad weight rows too
            Wf = np.concatenate(
                [Wf, np.zeros((in_w - Wf.shape[0], Wf.shape[1]), np.float32)], axis=0)

        fused.append((Wf, bf))
        meta_raw.append((int(Wf.shape[0]), int(Wf.shape[1]), do_max, int(gsz)))

    # ---- MLR: permute rows from [h^2, h, hz^2, hz] to [h^2, hz^2, h, hz], pad cols ----
    Wm = np.asarray(mlr[0], np.float32).T               # [mlr_in, num_class]
    bm = np.asarray(mlr[1], np.float32)
    h_last = int(layer[-1][0].shape[0])
    hz_last = int(layerz[-1][0].shape[0])
    mlr_in, num_class = int(Wm.shape[0]), int(Wm.shape[1])
    assert mlr_in == 2 * (h_last + hz_last)
    perm = np.concatenate([
        np.arange(0, h_last),                           # h^2
        np.arange(2 * h_last, 2 * h_last + hz_last),    # hz^2
        np.arange(h_last, 2 * h_last),                  # h
        np.arange(2 * h_last + hz_last, mlr_in),        # hz
    ])
    Wm = Wm[perm]
    out_w = _round_up(num_class + h_last + hz_last, 128)
    y_pad = out_w - (h_last + hz_last)                  # >= num_class
    Wm_p = np.zeros((mlr_in, y_pad), np.float32)
    Wm_p[:, :num_class] = Wm
    bm_p = np.zeros((y_pad,), np.float32)
    bm_p[:num_class] = bm

    # ---- pack everything into one lane-dense buffer ----
    all_layers = fused + [(Wm_p, bm_p)]
    col_w = _round_up(max(int(w.shape[1]) for w, _ in all_layers), 128)
    offs, r = [], 0
    for w, _ in all_layers:
        offs.append(r)
        r += _round_up(int(w.shape[0]) + 1, 8)          # weight rows + 1 bias row, 8-aligned
    P = np.zeros((r, col_w), np.float32)
    for (w, b), off in zip(all_layers, offs):
        ind, outd = w.shape
        P[off:off + ind, :outd] = w
        P[off + ind, :outd] = b

    layer_meta = tuple((offs[k],) + meta_raw[k] for k in range(nL))
    mlr_meta = (offs[-1], mlr_in, y_pad)
    return (jnp.asarray(P), layer_meta, mlr_meta,
            out_w, y_pad, num_class, h_last, hz_last)


# ----------------------------- wrapper -------------------------------------

def net_forward_pallas(x, layer, layerz, mlr, pool_size, ar_order, num_dim):
    B = x.shape[0]
    x = jnp.asarray(x, jnp.float32)
    h0 = x.reshape(B, -1)                                # [B, num_dim*(ar_order+1)]
    hz0 = x[:, 1:, :].reshape(B, -1)                     # [B, num_dim*ar_order]
    in_raw = h0.shape[1] + hz0.shape[1]
    IN_W = _round_up(in_raw, 128)

    (P, layer_meta, mlr_meta, OUT_W, y_pad,
     num_class, h_last, hz_last) = pack_params(layer, layerz, mlr, pool_size, IN_W)

    # batch padded to full sublanes; tile over a parallel grid (v7x: both TensorCores)
    TILE_B = 128 if B >= 128 else _round_up(max(B, 1), 8)
    B_pad = _round_up(B, TILE_B)

    x_in = jnp.zeros((B_pad, IN_W), jnp.float32)
    x_in = x_in.at[:B, :h0.shape[1]].set(h0)
    x_in = x_in.at[:B, h0.shape[1]:in_raw].set(hz0)

    kernel = make_net_kernel(layer_meta, mlr_meta, pool_size)
    R, C = int(P.shape[0]), int(P.shape[1])

    out = pl.pallas_call(
        kernel,
        out_shape=jax.ShapeDtypeStruct((B_pad, OUT_W), jnp.float32),
        grid=(B_pad // TILE_B,),
        in_specs=[
            pl.BlockSpec((TILE_B, IN_W), lambda i: (i, 0)),   # activations: tiled over batch
            pl.BlockSpec((R, C), lambda i: (0, 0)),           # packed params: resident
        ],
        out_specs=pl.BlockSpec((TILE_B, OUT_W), lambda i: (i, 0)),
        compiler_params=pltpu.CompilerParams(
            dimension_semantics=("parallel",),
            vmem_limit_bytes=32 * 1024 * 1024,
        ),
    )(x_in, P)

    y = out[:B, 0:num_class]
    h = out[:B, y_pad:y_pad + h_last]
    hz = out[:B, y_pad + h_last:y_pad + h_last + hz_last]
    return y, h, hz


# ----------------------------- parameter init (torch-style) ----------------

def xavier_uniform(key, fan_in, fan_out):
    bound = float(np.sqrt(6.0 / (fan_in + fan_out)))
    return jax.random.uniform(key, (fan_out, fan_in), jnp.float32, -bound, bound)


def linear_bias(key, fan_in, fan_out):
    bound = float(1.0 / np.sqrt(fan_in))
    return jax.random.uniform(key, (fan_out,), jnp.float32, -bound, bound)


def init_params(key, h_sizes, num_dim, num_class, ar_order, h_sizes_z, pool_size):
    if h_sizes_z is None:
        h_sizes_z = list(h_sizes)

    def build_branch(key, in_dim, sizes):
        aug = [in_dim] + list(sizes)
        params = []
        for k in range(1, len(aug) - 1):
            key, kw, kb = jax.random.split(key, 3)
            params.append((xavier_uniform(kw, aug[k - 1], aug[k] * pool_size),
                           linear_bias(kb, aug[k - 1], aug[k] * pool_size)))
        key, kw, kb = jax.random.split(key, 3)
        params.append((xavier_uniform(kw, aug[-2], aug[-1]),
                       linear_bias(kb, aug[-2], aug[-1])))
        return key, params

    key, layer = build_branch(key, num_dim * (ar_order + 1), h_sizes)
    key, layerz = build_branch(key, num_dim * ar_order, h_sizes_z)

    mlr_in = (h_sizes[-1] + h_sizes_z[-1]) * 2
    key, kw, kb = jax.random.split(key, 3)
    return layer, layerz, (xavier_uniform(kw, mlr_in, num_class),
                           linear_bias(kb, mlr_in, num_class))


# ----------------------------- pure-JAX reference ---------------------------

def net_forward_ref(x, layer, layerz, mlr, pool_size):
    B = x.shape[0]

    def maxout(h):
        C = h.shape[1]
        return jnp.max(h.reshape(B, C // pool_size, pool_size), axis=2)

    def branch(h, params):
        n = len(params)
        for k, (w, b) in enumerate(params):
            h = h @ w.T + b
            if k != n - 1:
                h = maxout(h)
        return h

    h = branch(x.reshape(B, -1), layer)
    hz = branch(x[:, 1:, :].reshape(B, -1), layerz)
    hhz = jnp.concatenate([h ** 2, h, hz ** 2, hz], axis=1)
    w_mlr, b_mlr = mlr
    y = hhz @ w_mlr.T + b_mlr
    return y, h, hz


# ----------------------------- main -----------------------------------------

if __name__ == "__main__":
    h_sizes = [32, 32]
    num_dim = 4
    num_class = 5
    ar_order = 1
    pool_size = 2
    B = 2

    key = jax.random.PRNGKey(0)
    key, kp, kx = jax.random.split(key, 3)
    layer, layerz, mlr = init_params(kp, h_sizes, num_dim, num_class,
                                     ar_order, None, pool_size)

    # x: [batch, time(t:t-p), dim] = [2, ar_order+1, num_dim]
    x = jax.random.normal(kx, (B, ar_order + 1, num_dim), jnp.float32)

    y, h, hz = net_forward_pallas(x, layer, layerz, mlr, pool_size, ar_order, num_dim)
    jax.block_until_ready((y, h, hz))

    y_ref, h_ref, hz_ref = net_forward_ref(x, layer, layerz, mlr, pool_size)
    np.testing.assert_allclose(np.asarray(y), np.asarray(y_ref), rtol=1e-4, atol=1e-4)
    np.testing.assert_allclose(np.asarray(h), np.asarray(h_ref), rtol=1e-4, atol=1e-4)
    np.testing.assert_allclose(np.asarray(hz), np.asarray(hz_ref), rtol=1e-4, atol=1e-4)

    print("KERNEL_OK")
</pallas_src>

<mosaic_0001>
module attributes {stable_mosaic.version = 11 : i64} {
  func.func @kernel(%arg0: i32, %arg1: memref<8x128xf32, #tpu.memory_space<vmem>>, %arg2: memref<344x128xf32, #tpu.memory_space<vmem>>, %arg3: memref<8x128xf32, #tpu.memory_space<vmem>>) attributes {dimension_semantics = [#tpu.dimension_semantics<parallel>], iteration_bounds = array<i64: 1>, scalar_prefetch = 0 : i64, scratch_operands = 0 : i64, tpu.core_type = #tpu.core_type<tc>, window_params = [{transform_indices = @transform_0, window_bounds = array<i64: 8, 128>}, {pipeline_mode = #tpu.pipeline_mode<synchronous>, transform_indices = @transform_1, window_bounds = array<i64: 344, 128>}, {transform_indices = @transform_2, window_bounds = array<i64: 8, 128>}]} {
    %c0 = arith.constant 0 : index
    %c0_0 = arith.constant 0 : index
    %0 = vector.load %arg1[%c0, %c0_0] : memref<8x128xf32, #tpu.memory_space<vmem>>, vector<8x128xf32>
    %c0_1 = arith.constant 0 : index
    %c0_2 = arith.constant 0 : index
    %1 = vector.load %arg2[%c0_1, %c0_2] : memref<344x128xf32, #tpu.memory_space<vmem>>, vector<128x128xf32>
    %c128 = arith.constant 128 : index
    %c0_3 = arith.constant 0 : index
    %2 = vector.load %arg2[%c128, %c0_3] : memref<344x128xf32, #tpu.memory_space<vmem>>, vector<1x128xf32>
    %cst = arith.constant dense<0.000000e+00> : vector<8x128xf32>
    %3 = tpu.matmul %0, %1, %cst {dimension_numbers = #tpu.dot_dimension_numbers<[1], [0], [0], [1], [0, 0, 1, 1], [], []>} : vector<8x128xf32>, vector<128x128xf32>, vector<8x128xf32> -> vector<8x128xf32>
    %4 = vector.broadcast %2 : vector<1x128xf32> to vector<8x128xf32>
    %5 = arith.addf %3, %4 : vector<8x128xf32>
    %6 = vector.extract_strided_slice %5 {offsets = [0, 0], sizes = [8, 64], strides = [1, 1]} : vector<8x128xf32> to vector<8x64xf32>
    %7 = vector.extract_strided_slice %5 {offsets = [0, 64], sizes = [8, 64], strides = [1, 1]} : vector<8x128xf32> to vector<8x64xf32>
    %8 = arith.maximumf %6, %7 : vector<8x64xf32>
    %c136 = arith.constant 136 : index
    %c0_4 = arith.constant 0 : index
    %9 = vector.load %arg2[%c136, %c0_4] : memref<344x128xf32, #tpu.memory_space<vmem>>, vector<64x64xf32>
    %c200 = arith.constant 200 : index
    %c0_5 = arith.constant 0 : index
    %10 = vector.load %arg2[%c200, %c0_5] : memref<344x128xf32, #tpu.memory_space<vmem>>, vector<1x64xf32>
    %cst_6 = arith.constant dense<0.000000e+00> : vector<8x64xf32>
    %11 = tpu.matmul %8, %9, %cst_6 {dimension_numbers = #tpu.dot_dimension_numbers<[1], [0], [0], [1], [0, 0, 1, 1], [], []>} : vector<8x64xf32>, vector<64x64xf32>, vector<8x64xf32> -> vector<8x64xf32>
    %12 = vector.broadcast %10 : vector<1x64xf32> to vector<8x64xf32>
    %13 = arith.addf %11, %12 : vector<8x64xf32>
    %c208 = arith.constant 208 : index
    %c0_7 = arith.constant 0 : index
    %14 = vector.load %arg2[%c208, %c0_7] : memref<344x128xf32, #tpu.memory_space<vmem>>, vector<128x64xf32>
    %c336 = arith.constant 336 : index
    %c0_8 = arith.constant 0 : index
    %15 = vector.load %arg2[%c336, %c0_8] : memref<344x128xf32, #tpu.memory_space<vmem>>, vector<1x64xf32>
    %16 = arith.mulf %13, %13 : vector<8x64xf32>
    %17 = tpu.concatenate %16, %13 in 1 : vector<8x64xf32>, vector<8x64xf32> -> vector<8x128xf32>
    %cst_9 = arith.constant dense<0.000000e+00> : vector<8x64xf32>
    %18 = tpu.matmul %17, %14, %cst_9 {dimension_numbers = #tpu.dot_dimension_numbers<[1], [0], [0], [1], [0, 0, 1, 1], [], []>} : vector<8x128xf32>, vector<128x64xf32>, vector<8x64xf32> -> vector<8x64xf32>
    %19 = vector.broadcast %15 : vector<1x64xf32> to vector<8x64xf32>
    %20 = arith.addf %18, %19 : vector<8x64xf32>
    %21 = tpu.concatenate %20, %13 in 1 : vector<8x64xf32>, vector<8x64xf32> -> vector<8x128xf32>
    %c0_10 = arith.constant 0 : index
    %c0_11 = arith.constant 0 : index
    %22 = vector.load %arg3[%c0_10, %c0_11] : memref<8x128xf32, #tpu.memory_space<vmem>>, vector<8x128xf32>
    tpu.vector_store %arg3[%c0_10, %c0_11], %21 {strides = array<i32>} : memref<8x128xf32, #tpu.memory_space<vmem>>, vector<8x128xf32>,
    return
  }
  func.func @transform_0(%arg0: i32) -> (i32, i32) {
    %c0_i32 = arith.constant 0 : i32
    %c0_i32_0 = arith.constant 0 : i32
    return %arg0, %c0_i32 : i32, i32
  }
  func.func @transform_1(%arg0: i32) -> (i32, i32) {
    %c0_i32 = arith.constant 0 : i32
    %c0_i32_0 = arith.constant 0 : i32
    %c0_i32_1 = arith.constant 0 : i32
    return %c0_i32, %c0_i32_0 : i32, i32
  }
  func.func @transform_2(%arg0: i32) -> (i32, i32) {
    %c0_i32 = arith.constant 0 : i32
    %c0_i32_0 = arith.constant 0 : i32
    return %arg0, %c0_i32 : i32, i32
  }
}

</mosaic_0001>

<bundles_post_ra>
// kernel: tpu_custom_call.1
= control target key start
LH: loop header
LB: loop body
LE: loop exit
PB: predicated region body
PF: predicated region fallthrough
CT: control target
= control target key end

     0   :  { %7 = vsyncpa [#allocation3], 0  ;;  %s712_s0 = inlined_call_operand.hbm [shape: f32[8,128], index: 0, kind: input, shape index: {}]   ;;  %s713_s1 = inlined_call_operand.hbm [shape: f32[344,128], index: 1, kind: input, shape index: {}]   ;;  %s714_s2 = inlined_call_operand.hbm [shape: f32[8,128], index: 2, kind: output, shape index: {}]  }
   0x1   :  { %8 = vsyncpa [#allocation6], 0 }
   0x2   :  { %9 = vsyncpa [#allocation4], 0  ;;  %s614_s9 = smov [#allocation2]   ;;  %s615_s11 = smov [#allocation5]  }
   0x3   :  { %s16_s10 = sshll.u32 %s614_s9, 4  ;;  %s25_s12 = sshll.u32 %s615_s11, 4  ;;  %s17_s10 = int_to_ptr.vmem [resolvable:$true] %s16_s10  ;;  %s638_s12 = int_to_ptr.vmem [resolvable:$true] %s25_s12 }
   0x4   :  { %s542_s15 = scalar_lea.hbm %s712_s0, 128 }
   0x5   :  { %p543_p0 = scmp.ne.s32.totalorder %s712_s0, %s542_s15  ;;  %p546_p1 = scmp.lt.u32.totalorder %s542_s15, %s712_s0 }
   0x7   :  { %p548_p2 = pnand %p546_p1, %p543_p0 }
   0x9   :  { %551 = shalt.err (!%p548_p2)
}
   0xa   :  { %s552_s20 = scalar_lea.vmem %s17_s10, 128  ;;  %p557_p4 = scmp.lt.s32.totalorder %s17_s10, %s17_s10 }
   0xb   :  { %p553_p3 = scmp.ne.s32.totalorder %s17_s10, %s552_s20  ;;  %p558_p5 = scmp.lt.s32.totalorder %s552_s20, %s552_s20 }
   0xd   :  { %p559_p6 = por %p558_p5, %p557_p4 }
   0xf   :  { %p560_p7 = pnand %p559_p6, %p553_p3 }
  0x11   :  { %563 = shalt.err (!%p560_p7)
}
  0x12   :  { %19 = dma.hbm_to_vmem [thread:$0]  %s712_s0, 128, %s17_s10, [#allocation3]  }
  0x13   :  { %s564_s25 = scalar_lea.hbm %s713_s1, 5504 }
  0x14   :  { %p565_p8 = scmp.ne.s32.totalorder %s713_s1, %s564_s25  ;;  %p568_p9 = scmp.lt.u32.totalorder %s564_s25, %s713_s1 }
  0x16   :  { %p570_p10 = pnand %p568_p9, %p565_p8 }
  0x18   :  { %573 = shalt.err (!%p570_p10)
}
  0x19   :  { %s574_s30 = scalar_lea.vmem %s638_s12, 5504  ;;  %p579_p12 = scmp.lt.s32.totalorder %s638_s12, %s638_s12 }
  0x1a   :  { %p575_p11 = scmp.ne.s32.totalorder %s638_s12, %s574_s30  ;;  %p580_p13 = scmp.lt.s32.totalorder %s574_s30, %s574_s30 }
  0x1c   :  { %p581_p0 = por %p580_p13, %p579_p12 }
  0x1e   :  { %p582_p1 = pnand %p581_p0, %p575_p11 }
  0x20   :  { %585 = shalt.err (!%p582_p1)
}
  0x21   :  { %s616_s0 = smov 128   ;;  %s617_s3 = smov 8  }
  0x22   :  { %31 = dma.hbm_to_vmem [thread:$0]  %s713_s1, 5504, %s638_s12, [#allocation6], %s616_s0, %s616_s0, %s617_s3  }
  0x23   :  { %608 = dma.done.wait [#allocation3], 128  }
  0x24   :  { %609 = vsyncadd [#allocation3], 4294967168 }
  0x25   :  { %610 = dma.done.wait [#allocation6], 5504  }
  0x26   :  { %611 = vsyncadd [#allocation6], 4294961792  ;;  %v618_v0 = vmov 0.0|0.0   ;;  %vm619_vm0 = vmmov 0   ;;  %v620_v1 = vmov 0.0   ;;  %v39_v2 = vld [vmem:[#allocation5] sm:$0xff] }
  0x27   :  { %473 = vmatprep.subr.bf16.mxu0 %v618_v0  ;;  %416 = vmatprep.mubr.msk.f32.mxu0 %vm619_vm0, %v620_v1  ;;  %v40_v3 = vld [vmem:[#allocation5 + $0x8] sm:$0xff]  ;;  %v41_v4 = vld [vmem:[#allocation5 + $0x10] sm:$0xff]  ;;  %v42_v6 = vld [vmem:[#allocation5 + $0x18] sm:$0xff]  ;;  %s621_s1 = smov 64   ;;  %vm148_vm1 = vcmask 523264   ;;  %s622_s6 = smov [#allocation7]  }
  0x28   :  { %497 = vmatprep.subr.bf16.mxu1 %v618_v0  ;;  %435 = vmatprep.mubr.msk.f32.mxu1 %vm619_vm0, %v620_v1  ;;  %v474_v5 = vpack.c.bf16 %v40_v3, %v39_v2  ;;  %v477_v7 = vpack.c.bf16 %v42_v6, %v41_v4  ;;  %v43_v8 = vld [vmem:[#allocation5 + $0x20] sm:$0xff]  ;;  %v44_v9 = vld [vmem:[#allocation5 + $0x28] sm:$0xff]  ;;  %v45_v11 = vld [vmem:[#allocation5 + $0x30] sm:$0xff]  ;;  %s327_s7 = sshll.u32 %s622_s6, 4  ;;  %s328_s7 = int_to_ptr.vmem [resolvable:$true] %s327_s7 }
  0x29   :  { %v480_v10 = vpack.c.bf16 %v44_v9, %v43_v8  ;;  %v46_v12 = vld [vmem:[#allocation5 + $0x38] sm:$0xff]  ;;  %v47_v14 = vld [vmem:[#allocation5 + $0x40] sm:$0xff]  ;;  %v48_v15 = vld [vmem:[#allocation5 + $0x48] sm:$0xff]  ;;  %s586_s8 = scalar_lea.vmem %s328_s7, 128  ;;  %p591_p3 = scmp.lt.s32.totalorder %s328_s7, %s328_s7 }
  0x2a   :  { %475 = vmatpush3.bf16.msra.mxu0 %v474_v5  ;;  %v483_v13 = vpack.c.bf16 %v46_v12, %v45_v11  ;;  %v486_v16 = vpack.c.bf16 %v48_v15, %v47_v14  ;;  %v49_v17 = vld [vmem:[#allocation5 + $0x50] sm:$0xff]  ;;  %v50_v18 = vld [vmem:[#allocation5 + $0x58] sm:$0xff]  ;;  %v51_v20 = vld [vmem:[#allocation5 + $0x60] sm:$0xff]  ;;  %p587_p2 = scmp.ne.s32.totalorder %s328_s7, %s586_s8  ;;  %p592_p4 = scmp.lt.s32.totalorder %s586_s8, %s586_s8 }
  0x2b   :  { %476 = vmatprep.subr.bf16.mxu0 %v618_v0  ;;  %v489_v19 = vpack.c.bf16 %v50_v18, %v49_v17  ;;  %v52_v21 = vld [vmem:[#allocation5 + $0x68] sm:$0xff]  ;;  %v53_v23 = vld [vmem:[#allocation5 + $0x70] sm:$0xff]  ;;  %v54_v24 = vld [vmem:[#allocation5 + $0x78] sm:$0xff] }
  0x2c   :  { %v492_v22 = vpack.c.bf16 %v52_v21, %v51_v20  ;;  %v495_v25 = vpack.c.bf16 %v54_v24, %v53_v23  ;;  %v38_v26 = vld [vmem:[#allocation2] sm:$0xff]  ;;  %v135_v27 = vld [vmem:[#allocation5 + $0x88] sm:$0xff]  ;;  %v136_v28 = vld [vmem:[#allocation5 + $0x90] sm:$0xff]  ;;  %p593_p5 = por %p592_p4, %p591_p3 }
  0x2d   :  { %v137_v29 = vld [vmem:[#allocation5 + $0x98] sm:$0xff]  ;;  %v498_v30 = vpack.c.bf16 %v136_v28, %v135_v27  ;;  %v138_v31 = vld [vmem:[#allocation5 + $0xa0] sm:$0xff]  ;;  %v139_v33 = vld [vmem:[#allocation5 + $0xa8] sm:$0xff] }
  0x2e   :  { %478 = vmatpush3.bf16.msra.mxu0 %v477_v7  ;;  %v501_v32 = vpack.c.bf16 %v138_v31, %v137_v29  ;;  %v140_v34 = vld [vmem:[#allocation5 + $0xb0] sm:$0xff]  ;;  %v141_v36 = vld [vmem:[#allocation5 + $0xb8] sm:$0xff]  ;;  %v142_v37 = vld [vmem:[#allocation5 + $0xc0] sm:$0xff]  ;;  %p594_p6 = pnand %p593_p5, %p587_p2 }
  0x2f   :  { %479 = vmatprep.subr.bf16.mxu0 %v618_v0  ;;  %499 = vmatpush3.bf16.msra.mxu1 %v498_v30  ;;  %v504_v35 = vpack.c.bf16 %v140_v34, %v139_v33  ;;  %v507_v38 = vpack.c.bf16 %v142_v37, %v141_v36  ;;  %v337_v39 = vld [vmem:[#allocation5 + $0x80] ss:$0 sm:$0xff]  ;;  %v222_v45 = vld [vmem:[#allocation5 + $0xd0] sm:$0xff]  ;;  %v223_v46 = vld [vmem:[#allocation5 + $0xd8] sm:$0xff] }
  0x30   :  { %500 = vmatprep.subr.bf16.mxu1 %v618_v0  ;;  %v224_v47 = vld [vmem:[#allocation5 + $0xe0] sm:$0xff]  ;;  %v510_v48 = vpack.c.bf16 %v223_v46, %v222_v45  ;;  %v225_v49 = vld [vmem:[#allocation5 + $0xe8] sm:$0xff]  ;;  %v226_v51 = vld [vmem:[#allocation5 + $0xf0] sm:$0xff] }
  0x31   :  { %v513_v50 = vpack.c.bf16 %v225_v49, %v224_v47  ;;  %v227_v52 = vld [vmem:[#allocation5 + $0xf8] sm:$0xff]  ;;  %v228_v54 = vld [vmem:[#allocation5 + $0x100] sm:$0xff]  ;;  %v229_v55 = vld [vmem:[#allocation5 + $0x108] sm:$0xff] }
  0x32   :  { %481 = vmatpush3.bf16.msra.mxu0 %v480_v10  ;;  %v516_v53 = vpack.c.bf16 %v227_v52, %v226_v51  ;;  %v519_v56 = vpack.c.bf16 %v229_v55, %v228_v54  ;;  %v230_v57 = vld [vmem:[#allocation5 + $0x110] sm:$0xff]  ;;  %v231_v58 = vld [vmem:[#allocation5 + $0x118] sm:$0xff]  ;;  %v232_v60 = vld [vmem:[#allocation5 + $0x120] sm:$0xff] }
  0x33   :  { %482 = vmatprep.subr.bf16.mxu0 %v618_v0  ;;  %502 = vmatpush3.bf16.msra.mxu1 %v501_v32  ;;  %v522_v59 = vpack.c.bf16 %v231_v58, %v230_v57  ;;  %v233_v61 = vld [vmem:[#allocation5 + $0x128] sm:$0xff]  ;;  %v234_v63 = vld [vmem:[#allocation5 + $0x130] sm:$0xff]  ;;  %v236_v3 = vld [vmem:[#allocation5 + $0x140] sm:$0xff] }
  0x34   :  { %503 = vmatprep.subr.bf16.mxu1 %v618_v0  ;;  %v525_v62 = vpack.c.bf16 %v233_v61, %v232_v60  ;;  %v237_v4 = vld [vmem:[#allocation5 + $0x148] sm:$0xff] }
  0x35   :  { %v531_v5 = vpack.c.bf16 %v237_v4, %v236_v3  ;;  %v338_v6 = vld [vmem:[#allocation5 + $0xc8] ss:$0 sm:$0xff] }
  0x36   :  { %484 = vmatpush3.bf16.msra.mxu0 %v483_v13  ;;  %v340_v13 = vld [vmem:[#allocation5 + $0x150] ss:$0 sm:$0xff] }
  0x37   :  { %485 = vmatprep.subr.bf16.mxu0 %v618_v0  ;;  %505 = vmatpush3.bf16.msra.mxu1 %v504_v35 }
  0x38   :  { %506 = vmatprep.subr.bf16.mxu1 %v618_v0 }
  0x3a   :  { %487 = vmatpush3.bf16.msra.mxu0 %v486_v16 }
  0x3b   :  { %488 = vmatprep.subr.bf16.mxu0 %v618_v0  ;;  %508 = vmatpush3.bf16.msra.mxu1 %v507_v38 }
  0x3c   :  { %509 = vmatprep.subr.bf16.mxu1 %v618_v0 }
  0x3e   :  { %490 = vmatpush3.bf16.msra.mxu0 %v489_v19 }
  0x3f   :  { %491 = vmatprep.subr.bf16.mxu0 %v618_v0 }
  0x42   :  { %493 = vmatpush3.bf16.msra.mxu0 %v492_v22 }
  0x43   :  { %494 = vmatprep.subr.bf16.mxu0 %v618_v0 }
  0x46   :  { %496 = vmatpush3.bf16.msra.mxu0 %v495_v25 }
  0x49   :  { %417 = vmatmul.mubr.f32.vlgmr.msra.gmra.mrb[0].mxu0 %v38_v26 }
 0x11c   :  { %v126_v40 = vpop.f32.mrb[0].mxu0 }
 0x11d   :  { %v127_v41 = vadd.f32 %v337_v39, %v126_v40  ;;  %v418_v42 = vpop.f32.mrb[1].mxu0 }
 0x11f   :  { %131 = vrot.lane.b32.xlu0 %v127_v41, %s621_s1 }
 0x191   :  { %v132_v43 = vpop.permute.xlu0 %131 }
 0x192   :  { %v134_v44 = vmax.f32 %v127_v41, %v132_v43 }
 0x194   :  { %436 = vmatmul.mubr.msk.f32.vlgmr.msra.gmra.mrb[0].mxu1 %vm148_vm1, %v134_v44 }
 0x195   :  { %470 = vmatprep.mubr.msk.f32.mxu1 %vm619_vm0, %v620_v1  ;;  %511 = vmatpush3.bf16.msra.mxu1 %v510_v48  ;;  %v235_v1 = vld [vmem:[#allocation5 + $0x138] sm:$0xff] }
 0x196   :  { %512 = vmatprep.subr.bf16.mxu1 %v618_v0  ;;  %v528_v2 = vpack.c.bf16 %v235_v1, %v234_v63 }
 0x199   :  { %514 = vmatpush3.bf16.msra.mxu1 %v513_v50 }
 0x19a   :  { %515 = vmatprep.subr.bf16.mxu1 %v618_v0 }
 0x19d   :  { %517 = vmatpush3.bf16.msra.mxu1 %v516_v53 }
 0x19e   :  { %518 = vmatprep.subr.bf16.mxu1 %v618_v0 }
 0x1a1   :  { %520 = vmatpush3.bf16.msra.mxu1 %v519_v56 }
 0x1a2   :  { %521 = vmatprep.subr.bf16.mxu1 %v618_v0 }
 0x1a5   :  { %523 = vmatpush3.bf16.msra.mxu1 %v522_v59 }
 0x1a6   :  { %524 = vmatprep.subr.bf16.mxu1 %v618_v0 }
 0x1a9   :  { %526 = vmatpush3.bf16.msra.mxu1 %v525_v62 }
 0x1aa   :  { %527 = vmatprep.subr.bf16.mxu1 %v618_v0 }
 0x1ad   :  { %529 = vmatpush3.bf16.msra.mxu1 %v528_v2 }
 0x1ae   :  { %530 = vmatprep.subr.bf16.mxu1 %v618_v0 }
 0x1b1   :  { %532 = vmatpush3.bf16.msra.mxu1 %v531_v5 }
 0x267   :  { %v218_v7 = vpop.f32.mrb[0].mxu1 }
 0x268   :  { %v219_v8 = vadd.f32 %v338_v6, %v218_v7  ;;  %v437_v9 = vpop.f32.mrb[1].mxu1 }
 0x26a   :  { %241 = vrot.lane.b32.xlu0 %v219_v8, %s621_s1  ;;  %v239_v10 = vmul.f32 %v219_v8, %v219_v8 }
 0x2dc   :  { %v242_v11 = vpop.permute.xlu0 %241 }
 0x2dd   :  { %v244_v12 = vsel %vm148_vm1, %v239_v10, %v242_v11 }
 0x2de   :  { %471 = vmatmul.mubr.f32.vlgmr.msra.gmra.mrb[2].mxu1 %v244_v12 }
 0x3b1   :  { %v315_v14 = vpop.f32.mrb[2].mxu1 }
 0x3b2   :  { %v316_v15 = vadd.f32 %v340_v13, %v315_v14  ;;  %v472_v16 = vpop.f32.mrb[3].mxu1 }
 0x3b4   :  { %v319_v0 = vsel %vm148_vm1, %v316_v15, %v242_v11 }
 0x3b5   :  { %320 = vst [vmem:[#allocation7] sm:$0xff] %v319_v0 }
 0x3b6   :  { %597 = shalt.err (!%p594_p6)
}
 0x3b7   :  { %s598_s11 = scalar_lea.hbm %s714_s2, 128 }
 0x3b8   :  { %p599_p7 = scmp.ne.s32.totalorder %s714_s2, %s598_s11  ;;  %p602_p8 = scmp.lt.u32.totalorder %s598_s11, %s714_s2 }
 0x3ba   :  { %p604_p9 = pnand %p602_p8, %p599_p7 }
 0x3bc   :  { %607 = shalt.err (!%p604_p9)
}
 0x3bd   :  { %330 = dma.vmem_to_hbm [thread:$0]  %s328_s7, 128, %s714_s2, [#allocation4]  }
 0x3be   :  { %612 = dma.done.wait [#allocation4], 128  }
 0x3bf   :  { %613 = vsyncadd [#allocation4], 4294967168 }
 0x3c0   :  { %334 = vsyncpa [#allocation3], 1 }
 0x3c1   :  { %335 = vsyncpa [#allocation6], 1 }
 0x3c2   :  { %336 = vsyncpa [#allocation4], 1 }

</bundles_post_ra>
